<compile_context>
chip_gen: v7x
topology: tpu7x:2x2x1
jax: 0.10.0
libtpu: 0.0.40
codegen_flags: <defaults>
</compile_context>

<pallas_src>
import functools

import jax
import jax.numpy as jnp
from jax import lax
from jax.experimental import pallas as pl
from jax.experimental.pallas import tpu as pltpu


def _round_up(n, m):
    return ((n + m - 1) // m) * m


def _scale_pred_kernel(x_ref, w1_ref, s1_ref, b1_ref, w2_ref, b2_ref, o_ref, *, wp):
    # x_ref : (1, 1, (TILE_H+2)*Wp, 3*Cin)  bf16  dx-expanded, H-halo'd, row-flattened tile
    # w1_ref: (3, 3*Cin, Cmid)              bf16  3x3 weights with (dx, Cin) folded into K
    # s1_ref: (1, Cmid)                     f32   folded BN scale  (gamma / sqrt(var+eps))
    # b1_ref: (1, Cmid)                     f32   folded BN bias   (beta - mean*scale)
    # w2_ref: (Cmid, Cout_pad)              bf16  1x1 weights, zero-padded to lane-dense Cout_pad
    # b2_ref: (1, Cout_pad)                 f32
    # o_ref : (1, 1, TILE_H*Wp, Cout_pad)   f32   lane-dense flat output slab
    m = o_ref.shape[2]                     # TILE_H * Wp   (multiple of 8)
    cmid = w1_ref.shape[2]

    x = x_ref[0, 0]                        # (m + 2*wp, 3*Cin) bf16, loaded once

    # 3x3 conv: dx already folded into K; dy = 3 sublane-aligned shifted slices
    # (wp is a multiple of 8 so dy*wp slices never cross a vreg sublane group).
    acc = jnp.zeros((m, cmid), dtype=jnp.float32)
    for dy in range(3):
        acc = acc + jnp.dot(x[dy * wp: dy * wp + m, :], w1_ref[dy],
                            preferred_element_type=jnp.float32)

    # folded BatchNorm (inference) + LeakyReLU(0.1), in f32
    y1 = acc * s1_ref[0] + b1_ref[0]
    y1 = jnp.where(y1 > 0, y1, 0.1 * y1)

    # 1x1 conv with bias: (m, Cmid) @ (Cmid, Cout_pad), lane-dense store
    y2 = jnp.dot(y1.astype(jnp.bfloat16), w2_ref[...],
                 preferred_element_type=jnp.float32)
    o_ref[0, 0] = y2 + b2_ref[0]


def scale_prediction(x_nchw, w1_hwio, bn_scale, bn_bias, w2, b2, num_classes, *, tile_h=8):
    """x_nchw: (B, Cin, H, W) float32. Returns (B, 3, H, W, num_classes + 5) float32."""
    B, Cin, H, W = x_nchw.shape
    attr = num_classes + 5
    Cmid = 2 * Cin
    Cout = 3 * attr

    TILE_H = min(tile_h, H)
    nH = -(-H // TILE_H)                      # cdiv
    Hpad = nH * TILE_H
    Wp = _round_up(W + 2, 8)                  # flat rows stay sublane-aligned
    R = (TILE_H + 2) * Wp                     # input rows per tile (with 2-row halo)
    M = TILE_H * Wp                           # output rows per tile
    K1 = 3 * Cin
    Cout_pad = _round_up(Cout, 128)           # lane-dense output slab

    # --- input glue (fused XLA pass): NCHW->NHWC, bf16, zero-pad, dx-expand, H-halo tiles ---
    x = jnp.transpose(x_nchw, (0, 2, 3, 1)).astype(jnp.bfloat16)            # (B, H, W, Cin)
    x = jnp.pad(x, ((0, 0), (1, 1 + Hpad - H), (1, Wp + 1 - W), (0, 0)))    # (B, Hpad+2, Wp+2, Cin)
    xe = jnp.concatenate([x[:, :, dx:dx + Wp, :] for dx in range(3)], axis=-1)  # (B, Hpad+2, Wp, 3*Cin)
    xt = jnp.stack([xe[:, t * TILE_H: t * TILE_H + TILE_H + 2] for t in range(nH)], axis=1)
    xt = xt.reshape(B, nH, R, K1)                                            # (B, nH, R, 3*Cin) bf16

    # --- weights / epilogue params ---
    w1r = w1_hwio.reshape(3, K1, Cmid).astype(jnp.bfloat16)      # (dy, dx*Cin + c, m) matches xe layout
    w2p = jnp.pad(w2, ((0, 0), (0, Cout_pad - Cout))).astype(jnp.bfloat16)
    b2p = jnp.pad(b2, (0, Cout_pad - Cout)).astype(jnp.float32).reshape(1, Cout_pad)
    s1 = bn_scale.astype(jnp.float32).reshape(1, Cmid)
    b1 = bn_bias.astype(jnp.float32).reshape(1, Cmid)

    # NOTE: blocks are tiny at these shapes; for production channel counts (Cin up to
    # 512) the bf16 weights keep w1 well inside the scoped-VMEM default — set
    # vmem_limit_bytes / shrink TILE_H if you scale Cmid into the thousands.
    out_flat = pl.pallas_call(
        functools.partial(_scale_pred_kernel, wp=Wp),
        out_shape=jax.ShapeDtypeStruct((B, nH, M, Cout_pad), jnp.float32),
        grid=(B, nH),
        in_specs=[
            pl.BlockSpec((1, 1, R, K1), lambda b, t: (b, t, 0, 0)),
            pl.BlockSpec((3, K1, Cmid), lambda b, t: (0, 0, 0)),
            pl.BlockSpec((1, Cmid), lambda b, t: (0, 0)),
            pl.BlockSpec((1, Cmid), lambda b, t: (0, 0)),
            pl.BlockSpec((Cmid, Cout_pad), lambda b, t: (0, 0)),
            pl.BlockSpec((1, Cout_pad), lambda b, t: (0, 0)),
        ],
        out_specs=pl.BlockSpec((1, 1, M, Cout_pad), lambda b, t: (b, t, 0, 0)),
        compiler_params=pltpu.CompilerParams(
            dimension_semantics=("parallel", "parallel")),
    )(xt, w1r, s1, b1, w2p, b2p)

    # --- output glue: un-pad, split anchors, PyTorch layout (B, 3, H, W, attr) ---
    out = out_flat.reshape(B, nH, TILE_H, Wp, Cout_pad)[:, :, :, :W, :Cout]
    out = out.reshape(B, Hpad, W, Cout)[:, :H]
    out = out.reshape(B, H, W, 3, attr)
    # channel c of the conv output maps to (anchor = c // attr, field = c % attr),
    # identical to PyTorch's .reshape(B, 3, attr, H, W).permute(0, 1, 3, 4, 2)
    return jnp.transpose(out, (0, 3, 1, 2, 4))


def _reference(x_nchw, w1_hwio, bn_scale, bn_bias, w2, b2, num_classes):
    """Pure-JAX f32 reference (same folded-BN inference semantics)."""
    B, Cin, H, W = x_nchw.shape
    attr = num_classes + 5
    x = jnp.transpose(x_nchw, (0, 2, 3, 1))
    y1 = lax.conv_general_dilated(
        x, w1_hwio, window_strides=(1, 1), padding=((1, 1), (1, 1)),
        dimension_numbers=("NHWC", "HWIO", "NHWC"))
    y1 = y1 * bn_scale + bn_bias
    y1 = jnp.where(y1 > 0, y1, 0.1 * y1)
    y2 = jnp.einsum("bhwc,cd->bhwd", y1, w2) + b2
    return jnp.transpose(y2.reshape(B, H, W, 3, attr), (0, 3, 1, 2, 4))


if __name__ == "__main__":
    # Small deterministic config matching the module's forward:
    B, Cin, H, W = 2, 4, 16, 16
    num_classes = 3
    attr = num_classes + 5          # 8
    Cmid = 2 * Cin                  # 8
    Cout = 3 * attr                 # 24

    key = jax.random.PRNGKey(0)
    k = jax.random.split(key, 8)

    x = jax.random.normal(k[0], (B, Cin, H, W), dtype=jnp.float32)

    # Conv1 (3x3, no bias), stored HWIO for the channels-last kernel.
    w1 = 0.1 * jax.random.normal(k[1], (3, 3, Cin, Cmid), dtype=jnp.float32)
    # BatchNorm2d params / running stats (inference), folded into scale & bias.
    gamma = 1.0 + 0.1 * jax.random.normal(k[2], (Cmid,), dtype=jnp.float32)
    beta = 0.1 * jax.random.normal(k[3], (Cmid,), dtype=jnp.float32)
    run_mean = 0.1 * jax.random.normal(k[4], (Cmid,), dtype=jnp.float32)
    run_var = jax.random.uniform(k[5], (Cmid,), minval=0.5, maxval=1.5,
                                 dtype=jnp.float32)
    eps = 1e-5
    bn_scale = gamma / jnp.sqrt(run_var + eps)
    bn_bias = beta - run_mean * bn_scale
    # Conv2 (1x1, with bias).
    w2 = 0.1 * jax.random.normal(k[6], (Cmid, Cout), dtype=jnp.float32)
    b2 = 0.1 * jax.random.normal(k[7], (Cout,), dtype=jnp.float32)

    out = scale_prediction(x, w1, bn_scale, bn_bias, w2, b2, num_classes, tile_h=8)
    out = jax.block_until_ready(out)

    assert out.shape == (B, 3, H, W, attr), out.shape

    ref = _reference(x, w1, bn_scale, bn_bias, w2, b2, num_classes)
    # bf16 matmul inputs vs. the f32 reference -> loosened tolerance.
    assert jnp.allclose(out, ref, rtol=2e-2, atol=2e-2), \
        float(jnp.max(jnp.abs(out - ref)))

    print("KERNEL_OK")
</pallas_src>

<mosaic_0001>
module attributes {stable_mosaic.version = 11 : i64} {
  func.func @_scale_pred_kernel(%arg0: i32, %arg1: i32, %arg2: memref<1x1x240x12xbf16, #tpu.memory_space<vmem>>, %arg3: memref<3x12x8xbf16, #tpu.memory_space<vmem>>, %arg4: memref<1x8xf32, #tpu.memory_space<vmem>>, %arg5: memref<1x8xf32, #tpu.memory_space<vmem>>, %arg6: memref<8x128xbf16, #tpu.memory_space<vmem>>, %arg7: memref<1x128xf32, #tpu.memory_space<vmem>>, %arg8: memref<1x1x192x128xf32, #tpu.memory_space<vmem>>) attributes {dimension_semantics = [#tpu.dimension_semantics<parallel>, #tpu.dimension_semantics<parallel>], iteration_bounds = array<i64: 2, 2>, scalar_prefetch = 0 : i64, scratch_operands = 0 : i64, tpu.core_type = #tpu.core_type<tc>, window_params = [{transform_indices = @transform_0, window_bounds = array<i64: 1, 1, 240, 12>}, {pipeline_mode = #tpu.pipeline_mode<synchronous>, transform_indices = @transform_1, window_bounds = array<i64: 3, 12, 8>}, {pipeline_mode = #tpu.pipeline_mode<synchronous>, transform_indices = @transform_2, window_bounds = array<i64: 1, 8>}, {pipeline_mode = #tpu.pipeline_mode<synchronous>, transform_indices = @transform_3, window_bounds = array<i64: 1, 8>}, {pipeline_mode = #tpu.pipeline_mode<synchronous>, transform_indices = @transform_4, window_bounds = array<i64: 8, 128>}, {pipeline_mode = #tpu.pipeline_mode<synchronous>, transform_indices = @transform_5, window_bounds = array<i64: 1, 128>}, {transform_indices = @transform_6, window_bounds = array<i64: 1, 1, 192, 128>}]} {
    %c0 = arith.constant 0 : index
    %c0_0 = arith.constant 0 : index
    %c0_1 = arith.constant 0 : index
    %c0_2 = arith.constant 0 : index
    %0 = vector.load %arg2[%c0, %c0_0, %c0_1, %c0_2] : memref<1x1x240x12xbf16, #tpu.memory_space<vmem>>, vector<1x1x240x12xbf16>
    %1 = vector.shape_cast %0 : vector<1x1x240x12xbf16> to vector<240x12xbf16>
    %cst = arith.constant 0.000000e+00 : f32
    %2 = vector.broadcast %cst : f32 to vector<192x8xf32>
    %3 = vector.extract_strided_slice %1 {offsets = [0, 0], sizes = [192, 12], strides = [1, 1]} : vector<240x12xbf16> to vector<192x12xbf16>
    %c0_3 = arith.constant 0 : index
    %c0_4 = arith.constant 0 : index
    %c0_5 = arith.constant 0 : index
    %4 = vector.load %arg3[%c0_3, %c0_4, %c0_5] : memref<3x12x8xbf16, #tpu.memory_space<vmem>>, vector<1x12x8xbf16>
    %5 = vector.shape_cast %4 : vector<1x12x8xbf16> to vector<12x8xbf16>
    %cst_6 = arith.constant dense<0.000000e+00> : vector<192x8xf32>
    %6 = tpu.matmul %3, %5, %cst_6 {dimension_numbers = #tpu.dot_dimension_numbers<[1], [0], [0], [1], [0, 0, 1, 1], [], []>} : vector<192x12xbf16>, vector<12x8xbf16>, vector<192x8xf32> -> vector<192x8xf32>
    %7 = arith.addf %2, %6 : vector<192x8xf32>
    %8 = vector.extract_strided_slice %1 {offsets = [24, 0], sizes = [192, 12], strides = [1, 1]} : vector<240x12xbf16> to vector<192x12xbf16>
    %c1 = arith.constant 1 : index
    %c0_7 = arith.constant 0 : index
    %c0_8 = arith.constant 0 : index
    %9 = vector.load %arg3[%c1, %c0_7, %c0_8] : memref<3x12x8xbf16, #tpu.memory_space<vmem>>, vector<1x12x8xbf16>
    %10 = vector.shape_cast %9 : vector<1x12x8xbf16> to vector<12x8xbf16>
    %cst_9 = arith.constant dense<0.000000e+00> : vector<192x8xf32>
    %11 = tpu.matmul %8, %10, %cst_9 {dimension_numbers = #tpu.dot_dimension_numbers<[1], [0], [0], [1], [0, 0, 1, 1], [], []>} : vector<192x12xbf16>, vector<12x8xbf16>, vector<192x8xf32> -> vector<192x8xf32>
    %12 = arith.addf %7, %11 : vector<192x8xf32>
    %13 = vector.extract_strided_slice %1 {offsets = [48, 0], sizes = [192, 12], strides = [1, 1]} : vector<240x12xbf16> to vector<192x12xbf16>
    %c2 = arith.constant 2 : index
    %c0_10 = arith.constant 0 : index
    %c0_11 = arith.constant 0 : index
    %14 = vector.load %arg3[%c2, %c0_10, %c0_11] : memref<3x12x8xbf16, #tpu.memory_space<vmem>>, vector<1x12x8xbf16>
    %15 = vector.shape_cast %14 : vector<1x12x8xbf16> to vector<12x8xbf16>
    %cst_12 = arith.constant dense<0.000000e+00> : vector<192x8xf32>
    %16 = tpu.matmul %13, %15, %cst_12 {dimension_numbers = #tpu.dot_dimension_numbers<[1], [0], [0], [1], [0, 0, 1, 1], [], []>} : vector<192x12xbf16>, vector<12x8xbf16>, vector<192x8xf32> -> vector<192x8xf32>
    %17 = arith.addf %12, %16 : vector<192x8xf32>
    %c0_13 = arith.constant 0 : index
    %c0_14 = arith.constant 0 : index
    %18 = vector.load %arg4[%c0_13, %c0_14] : memref<1x8xf32, #tpu.memory_space<vmem>>, vector<1x8xf32>
    %19 = vector.shape_cast %18 : vector<1x8xf32> to vector<8xf32>
    %20 = vector.shape_cast %19 : vector<8xf32> to vector<1x8xf32>
    %21 = vector.broadcast %20 : vector<1x8xf32> to vector<192x8xf32>
    %22 = arith.mulf %17, %21 : vector<192x8xf32>
    %c0_15 = arith.constant 0 : index
    %c0_16 = arith.constant 0 : index
    %23 = vector.load %arg5[%c0_15, %c0_16] : memref<1x8xf32, #tpu.memory_space<vmem>>, vector<1x8xf32>
    %24 = vector.shape_cast %23 : vector<1x8xf32> to vector<8xf32>
    %25 = vector.shape_cast %24 : vector<8xf32> to vector<1x8xf32>
    %26 = vector.broadcast %25 : vector<1x8xf32> to vector<192x8xf32>
    %27 = arith.addf %22, %26 : vector<192x8xf32>
    %cst_17 = arith.constant 0.000000e+00 : f32
    %28 = vector.broadcast %cst_17 : f32 to vector<192x8xf32>
    %29 = arith.cmpf ogt, %27, %28 : vector<192x8xf32>
    %cst_18 = arith.constant 1.000000e-01 : f32
    %30 = vector.broadcast %cst_18 : f32 to vector<192x8xf32>
    %31 = arith.mulf %30, %27 : vector<192x8xf32>
    %32 = arith.select %29, %27, %31 : vector<192x8xi1>, vector<192x8xf32>
    %33 = arith.truncf %32 : vector<192x8xf32> to vector<192x8xbf16>
    %c0_19 = arith.constant 0 : index
    %c0_20 = arith.constant 0 : index
    %34 = vector.load %arg6[%c0_19, %c0_20] : memref<8x128xbf16, #tpu.memory_space<vmem>>, vector<8x128xbf16>
    %cst_21 = arith.constant dense<0.000000e+00> : vector<192x128xf32>
    %35 = tpu.matmul %33, %34, %cst_21 {dimension_numbers = #tpu.dot_dimension_numbers<[1], [0], [0], [1], [0, 0, 1, 1], [], []>} : vector<192x8xbf16>, vector<8x128xbf16>, vector<192x128xf32> -> vector<192x128xf32>
    %c0_22 = arith.constant 0 : index
    %c0_23 = arith.constant 0 : index
    %36 = vector.load %arg7[%c0_22, %c0_23] : memref<1x128xf32, #tpu.memory_space<vmem>>, vector<1x128xf32>
    %37 = vector.shape_cast %36 : vector<1x128xf32> to vector<128xf32>
    %38 = vector.shape_cast %37 : vector<128xf32> to vector<1x128xf32>
    %39 = vector.broadcast %38 : vector<1x128xf32> to vector<192x128xf32>
    %40 = arith.addf %35, %39 : vector<192x128xf32>
    %c0_24 = arith.constant 0 : index
    %c0_25 = arith.constant 0 : index
    %c0_26 = arith.constant 0 : index
    %c0_27 = arith.constant 0 : index
    %41 = vector.load %arg8[%c0_24, %c0_25, %c0_26, %c0_27] : memref<1x1x192x128xf32, #tpu.memory_space<vmem>>, vector<1x1x192x128xf32>
    %42 = vector.shape_cast %41 : vector<1x1x192x128xf32> to vector<192x128xf32>
    %43 = vector.shape_cast %40 : vector<192x128xf32> to vector<1x1x192x128xf32>
    tpu.vector_store %arg8[%c0_24, %c0_25, %c0_26, %c0_27], %43 {strides = array<i32>} : memref<1x1x192x128xf32, #tpu.memory_space<vmem>>, vector<1x1x192x128xf32>,
    return
  }
  func.func @transform_0(%arg0: i32, %arg1: i32) -> (i32, i32, i32, i32) {
    %c0_i32 = arith.constant 0 : i32
    %c0_i32_0 = arith.constant 0 : i32
    %c0_i32_1 = arith.constant 0 : i32
    return %arg0, %arg1, %c0_i32, %c0_i32_0 : i32, i32, i32, i32
  }
  func.func @transform_1(%arg0: i32, %arg1: i32) -> (i32, i32, i32) {
    %c0_i32 = arith.constant 0 : i32
    %c0_i32_0 = arith.constant 0 : i32
    %c0_i32_1 = arith.constant 0 : i32
    %c0_i32_2 = arith.constant 0 : i32
    return %c0_i32, %c0_i32_0, %c0_i32_1 : i32, i32, i32
  }
  func.func @transform_2(%arg0: i32, %arg1: i32) -> (i32, i32) {
    %c0_i32 = arith.constant 0 : i32
    %c0_i32_0 = arith.constant 0 : i32
    %c0_i32_1 = arith.constant 0 : i32
    return %c0_i32, %c0_i32_0 : i32, i32
  }
  func.func @transform_3(%arg0: i32, %arg1: i32) -> (i32, i32) {
    %c0_i32 = arith.constant 0 : i32
    %c0_i32_0 = arith.constant 0 : i32
    %c0_i32_1 = arith.constant 0 : i32
    return %c0_i32, %c0_i32_0 : i32, i32
  }
  func.func @transform_4(%arg0: i32, %arg1: i32) -> (i32, i32) {
    %c0_i32 = arith.constant 0 : i32
    %c0_i32_0 = arith.constant 0 : i32
    %c0_i32_1 = arith.constant 0 : i32
    return %c0_i32, %c0_i32_0 : i32, i32
  }
  func.func @transform_5(%arg0: i32, %arg1: i32) -> (i32, i32) {
    %c0_i32 = arith.constant 0 : i32
    %c0_i32_0 = arith.constant 0 : i32
    %c0_i32_1 = arith.constant 0 : i32
    return %c0_i32, %c0_i32_0 : i32, i32
  }
  func.func @transform_6(%arg0: i32, %arg1: i32) -> (i32, i32, i32, i32) {
    %c0_i32 = arith.constant 0 : i32
    %c0_i32_0 = arith.constant 0 : i32
    %c0_i32_1 = arith.constant 0 : i32
    return %arg0, %arg1, %c0_i32, %c0_i32_0 : i32, i32, i32, i32
  }
}

</mosaic_0001>

<bundles_post_ra>
// kernel: tpu_custom_call.1
= control target key start
LH: loop header
LB: loop body
LE: loop exit
PB: predicated region body
PF: predicated region fallthrough
CT: control target
= control target key end

     0   :  { %11 = vsyncpa [#allocation3], 0  ;;  %s2328_s0 = inlined_call_operand.vmem [shape: bf16[2,2,240,12], index: 0, kind: input, shape index: {}]   ;;  %s2329_s1 = inlined_call_operand.vmem [shape: bf16[3,12,8], index: 1, kind: input, shape index: {}]   ;;  %s2330_s2 = inlined_call_operand.vmem [shape: f32[1,8], index: 2, kind: input, shape index: {}]   ;;  %s2331_s3 = inlined_call_operand.vmem [shape: f32[1,8], index: 3, kind: input, shape index: {}]   ;;  %s2332_s4 = inlined_call_operand.vmem [shape: bf16[8,128], index: 4, kind: input, shape index: {}]   ;;  %s2333_s5 = inlined_call_operand.vmem [shape: f32[1,128], index: 5, kind: input, shape index: {}]   ;;  %s2334_s6 = inlined_call_operand.hbm [shape: f32[2,2,192,128], index: 6, kind: output, shape index: {}]  }
   0x1   :  { %13 = vsyncpa [#allocation3 + $0x1], 0  ;;  %s1915_s21 = smov 0   ;;  %s1917_s22 = smov 0  }
   0x2   :  { %s1919_s23 = smov 0   ;;  %s1921_s24 = smov 0  }
   0x3   :  { %s1923_s25 = smov 0   ;;  %s1925_s26 = smov 0  }
   0x4   :  { %s1927_s27 = smov 0   ;;  %s1929_s28 = smov 0  }
   0x5 LB: > { %s1371_s29 = sadd.s32 4294967295, %s1875_s28   ;;  %s1372_s30 = sadd.s32 4294967294, %s1875_s28   ;;  %s1875_s28 = sphi %s1929_s28, %s19_s28   ;;  %s1871_s27 = sphi %s1927_s27, %s2343_s27   ;;  %s1867_s26 = sphi %s1925_s26, %s2342_s26   ;;  %s1863_s25 = sphi %s1923_s25, %s2341_s25   ;;  %s1859_s24 = sphi %s1921_s24, %s2340_s24   ;;  %s1855_s23 = sphi %s1919_s23, %s2339_s23   ;;  %s1851_s22 = sphi %s1917_s22, %s2338_s22   ;;  %s1847_s21 = sphi %s1915_s21, %s2337_s21  }
   0x6   : > { %s28_s7 = sadd.s32 1, %s1867_s26  ;;  %s31_s8 = sadd.s32 1, %s1871_s27 }
   0x7   : > { %p29_p0 = scmp.ge.s32.totalorder %s28_s7, 2  ;;  %p183_p1 = scmp.ne.s32.totalorder %s1855_s23, %s1851_s22 }
   0x8   : > { %p184_p2 = scmp.eq.s32.totalorder %s1371_s29, 3  ;;  %p189_p5 = scmp.ne.s32.totalorder %s1851_s22, %s1847_s21 }
   0x9   : > { %s2345_s7 = smov (%p29_p0, %s28_s7), 0  ;;  %s2347_s8 = smov (!%p29_p0, %s31_s8), %s1871_s27 }
   0xa   : > { %s169_s9 = ssub.s32 %s1867_s26, %s2345_s7  ;;  %p1966_p3 = por %p184_p2, %p183_p1 }
   0xb   : > { %p33_p4 = scmp.ge.s32.totalorder %s2347_s8, 2  ;;  %p190_p6 = scmp.eq.s32.totalorder %s1372_s30, 3 }
   0xc   : > { %p1375_p7 = scmp.ge.s32.totalorder %s1875_s28, 1  ;;  %p235_p9 = scmp.lt.s32.totalorder %s1875_s28, 5 }
   0xd   : > { %s2349_s8 = smov (%p33_p4, %s2347_s8), 0  ;;  %p1975_p8 = por %p190_p6, %p189_p5 }
   0xe   : > { %s168_s12 = ssub.s32 %s1871_s27, %s2349_s8  ;;  %s173_s13 = sadd.s32 1, %s1855_s23 }
   0xf   : > { %s170_s14 = sor.u32 %s169_s9, %s168_s12  ;;  %p236_p10 = pnand %p1375_p7, %p235_p9 }
  0x10   : > { %p171_p11 = scmp.eq.s32.totalorder %s170_s14, 0  ;;  %vm416_vm0 = vcmask (!%p236_p10), 1045504   ;;  %p269_p12 = scmp.lt.s32.totalorder (!%p236_p10), %s1863_s25, 1  ;;  %v1751_v0 = vld [vmem:[%s2329_s1] sm:$0x3f] (!%p236_p10)   ;;  %vm1113_vm1 = vcmask (!%p236_p10), 1043456  }
  0x11   : > { %239 = sbr.rel (%p236_p10) target bundleno = 582 (0x246), region = 44  ;;  %p271_p13 = scmp.lt.s32.totalorder (!%p236_p10), %s1859_s24, 1  ;;  %v1753_v1 = vld [vmem:[%s2329_s1 + $0x10] sm:$0x3f] (!%p236_p10)   ;;  %1670 = vmatprep.subr.msk.bf16.mxu0 (!%p236_p10), %vm416_vm0, %v1751_v0  ;;  %v609_v2 = vsel (!%p236_p10), %vm416_vm0, %v1751_v0, 0  ;;  %vm379_vm2 = vcmask (!%p236_p10), 97280  }
  0x12   : > { %s1984_s15 = scalar_select %p171_p11, %s1855_s23, %s173_s13  }
  0x13   : > { %1544 = vmatpush3.bf16.msra.mxu0 (!%p236_p10), %v609_v2  ;;  %v1765_v3 = vld [vmem:[%s2329_s1 + $0x8] sm:$0x3f] (!%p236_p10)   ;;  %v1068_v4 = vld [vmem:[%s2332_s4] sm:$0xf] (!%p236_p10)  ;;  %v767_v11 = vsel (!%p236_p10), %vm416_vm0, %v1753_v1, 0  ;;  %vm1076_vm6 = vcmask (!%p236_p10), 64512  }
  0x14   : > { %1671 = vmatprep.subr.msk.bf16.mxu0 (!%p236_p10), %vm416_vm0, %v1753_v1  ;;  %1669 = vmatprep.subr.msk.bf16.mxu1 (!%p236_p10), %vm416_vm0, %v1765_v3  ;;  %v418_v5 = vsel (!%p236_p10), %vm416_vm0, %v1765_v3, 0  ;;  %v1115_v20 = vsel (!%p236_p10), %vm1113_vm1, %v1068_v4, 0  ;;  %s266_s14 = sand.u32 (!%p236_p10), 1, %s1851_s22   ;;  %s1676_s20 = smul.u32 (!%p236_p10), 24, %s1859_s24 }
  0x15   : > { %1518 = vmatpush3.bf16.msra.mxu1 (!%p236_p10), %v418_v5  ;;  %s1673_s16 = smul.u32 (!%p236_p10), 192, %s266_s14 }
  0x16   : > { %1672 = vmatprep.subr.msk.bf16.mxu1 (!%p236_p10), %vm1113_vm1, %v1068_v4 }
  0x18   : > { %s270_s18 = scalar_select %p269_p12, %s1863_s25, 1 }
  0x19   : > { %s272_s29 = scalar_select %p271_p13, %s1859_s24, 1 }
  0x1a   : > { %s1675_s30 = smul.u32 60, %s270_s18  ;;  %s2216_s18 = scalar_lea.vmem [#allocation2], %s1673_s16 }
  0x1b   : > { %s1674_s13 = smul.u32 30, %s272_s29  ;;  %s2276_s16 = scalar_lea.sflag [#allocation3], %s266_s14 }
  0x1d   : > { %s275_s17 = sadd.s32 %s1675_s30, %s1674_s13 }
  0x1e   : > { %s1376_s19 = sshll.u32 %s275_s17, 2 }
  0x1f   : > { %s2011_s29 = scalar_lea.vmem %s2328_s0, %s1376_s19  ;;  %s1877_s19 = smov [#allocation2]  }
  0x20   : > { %v1752_v6 = vld [vmem:[%s2011_s29] sm:$0xff]   ;;  %v281_v7 = vld [vmem:[%s2011_s29 + $0x8] sm:$0xf]  ;;  %v282_v8 = vld [vmem:[%s2011_s29 + $0xc] sm:$0xf] }
  0x21   : > { %v283_v9 = vld [vmem:[%s2011_s29 + $0x10] sm:$0xf]  ;;  %1545 = vmatprep.mubr.msk.bf16.mxu0 %vm379_vm2, %v1752_v6  ;;  %v1405_v10 = vcombine.low %v281_v7, %v282_v8  ;;  %v284_v12 = vld [vmem:[%s2011_s29 + $0x14] sm:$0xf]  ;;  %v285_v13 = vld [vmem:[%s2011_s29 + $0x18] sm:$0xf] }
  0x22   : > { %v1379_v14 = vcombine.low %v282_v8, %v283_v9  ;;  %v1406_v15 = vcombine.low %v283_v9, %v284_v12  ;;  %v286_v16 = vld [vmem:[%s2011_s29 + $0x1c] sm:$0xf]  ;;  %v287_v17 = vld [vmem:[%s2011_s29 + $0x20] sm:$0xf]  ;;  %v1380_v18 = vcombine.low %v284_v12, %v285_v13  ;;  %v288_v21 = vld [vmem:[%s2011_s29 + $0x24] sm:$0xf] }
  0x23   : > { %1546 = vmatmul.mubr.msk.bf16.vlgmr.msra.gmra.mrb[0].mxu0 %vm379_vm2, %v1405_v10  ;;  %v1381_v19 = vcombine.low %v286_v16, %v287_v17  ;;  %v1407_v22 = vcombine.low %v285_v13, %v286_v16  ;;  %v1408_v23 = vcombine.low %v287_v17, %v288_v21  ;;  %v289_v24 = vld [vmem:[%s2011_s29 + $0x28] sm:$0xf]  ;;  %v290_v25 = vld [vmem:[%s2011_s29 + $0x2c] sm:$0xf]  ;;  %v291_v26 = vld [vmem:[%s2011_s29 + $0x30] sm:$0xf] }
  0x24   : > { %1519 = vmatprep.mubr.msk.bf16.mxu1 %vm379_vm2, %v1379_v14  ;;  %1570 = vmatpush3.bf16.msra.mxu0 %v767_v11  ;;  %v1382_v27 = vcombine.low %v288_v21, %v289_v24  ;;  %v1383_v28 = vcombine.low %v290_v25, %v291_v26  ;;  %v292_v29 = vld [vmem:[%s2011_s29 + $0x34] sm:$0xf]  ;;  %v1409_v30 = vcombine.low %v289_v24, %v290_v25  ;;  %v293_v32 = vld [vmem:[%s2011_s29 + $0x38] sm:$0xf]  ;;  %v294_v33 = vld [vmem:[%s2011_s29 + $0x3c] sm:$0xf] }
  0x25   : > { %1549 = vmatprep.mubr.msk.bf16.mxu0 %vm379_vm2, %v1406_v15  ;;  %1520 = vmatmul.mubr.msk.bf16.vlgmr.msra.gmra.mrb[0].mxu1 %vm379_vm2, %v1380_v18  ;;  %v1410_v31 = vcombine.low %v291_v26, %v292_v29  ;;  %v295_v34 = vld [vmem:[%s2011_s29 + $0x40] sm:$0xf]  ;;  %v1384_v35 = vcombine.low %v292_v29, %v293_v32  ;;  %v296_v37 = vld [vmem:[%s2011_s29 + $0x44] sm:$0xf]  ;;  %v1411_v38 = vcombine.low %v293_v32, %v294_v33  ;;  %v297_v40 = vld [vmem:[%s2011_s29 + $0x48] sm:$0xf] }
  0x26   : > { %1523 = vmatprep.mubr.msk.bf16.mxu1 %vm379_vm2, %v1381_v19  ;;  %1596 = vmatpush3.bf16.msra.mxu1 %v1115_v20  ;;  %v1385_v36 = vcombine.low %v294_v33, %v295_v34  ;;  %v1412_v39 = vcombine.low %v295_v34, %v296_v37  ;;  %v298_v41 = vld [vmem:[%s2011_s29 + $0x4c] sm:$0xf]  ;;  %v299_v42 = vld [vmem:[%s2011_s29 + $0x50] sm:$0xf]  ;;  %v1386_v43 = vcombine.low %v296_v37, %v297_v40  ;;  %v300_v45 = vld [vmem:[%s2011_s29 + $0x54] sm:$0xf] }
  0x27   : > { %v1387_v44 = vcombine.low %v298_v41, %v299_v42  ;;  %v1413_v46 = vcombine.low %v297_v40, %v298_v41  ;;  %v1414_v47 = vcombine.low %v299_v42, %v300_v45  ;;  %v301_v48 = vld [vmem:[%s2011_s29 + $0x58] sm:$0xf]  ;;  %v302_v49 = vld [vmem:[%s2011_s29 + $0x5c] sm:$0xf]  ;;  %v303_v51 = vld [vmem:[%s2011_s29 + $0x60] sm:$0xf] }
  0x28   : > { %v1388_v50 = vcombine.low %v300_v45, %v301_v48  ;;  %v1389_v52 = vcombine.low %v302_v49, %v303_v51  ;;  %v305_v53 = vld [vmem:[%s2011_s29 + $0x68] sm:$0xf]  ;;  %v1415_v54 = vcombine.low %v301_v48, %v302_v49  ;;  %v304_v55 = vld [vmem:[%s2011_s29 + $0x64] sm:$0xf]  ;;  %v306_v57 = vld [vmem:[%s2011_s29 + $0x6c] sm:$0xf] }
  0x29   : > { %v1390_v56 = vcombine.low %v304_v55, %v305_v53  ;;  %v1431_v58 = vcombine.low %v303_v51, %v304_v55  ;;  %v1432_v59 = vcombine.low %v305_v53, %v306_v57  ;;  %v1780_v60 = vld [vmem:[%s2011_s29 + $0x70] sm:$0xff]   ;;  %v2119_v25 = vld [vmem:[%s2331_s3] ss:$0 sm:$0xff]  ;;  %s1677_s29 = smul.u32 48, %s1863_s25  ;;  %s1286_s25 = sshll.u32 %s2216_s18, 4  ;;  %s2268_s25 = int_to_ptr.vmem [resolvable:$true] %s1286_s25 }
  0x2a   : > { %s1781_s17 = scalar_lea.vmem %s2268_s25, 3072 }
  0x2b   : > { %1550 = vmatmul.mubr.msk.bf16.gmra.mrb[4].mxu0 %vm379_vm2, %v1407_v22  ;;  %s1283_s30 = sadd.s32 %s1677_s29, %s1676_s20  ;;  %p1782_p0 = scmp.ne.s32.totalorder %s2268_s25, %s1781_s17 }
  0x2c   : > { %1553 = vmatprep.mubr.msk.bf16.mxu0 %vm379_vm2, %v1408_v23  ;;  %s1462_s24 = sshll.u32 %s1283_s30, 7  ;;  %s1785_s20 = sshll.u32 %s1877_s19, 4  ;;  %s1786_s20 = int_to_ptr.vmem [resolvable:$false] %s1785_s20 }
  0x2d   : > { %1524 = vmatmul.mubr.msk.bf16.gmra.mrb[4].mxu1 %vm379_vm2, %v1382_v27  ;;  %s2266_s13 = scalar_lea.hbm %s2334_s6, %s1462_s24  ;;  %p1783_p1 = pnand %p1782_p0, %p1966_p3 }
  0x2e   : > { %1527 = vmatprep.mubr.msk.bf16.mxu1 %vm379_vm2, %v1383_v28  ;;  %s1787_s29 = scalar_lea.vmem %s1786_s20, 6144  ;;  %p1788_p4 = scmp.lt.s32.totalorder %s2268_s25, %s1786_s20 }
  0x2f   : > { %p1784_p2 = pneg %p1783_p1  ;;  %p1789_p5 = scmp.lt.s32.totalorder %s1787_s29, %s1781_s17 }
  0x31   : > { %p1790_p6 = por %p1789_p5, %p1788_p4 }
  0x33   : > { %1554 = vmatmul.mubr.msk.bf16.gmra.mrb[8].mxu0 %vm379_vm2, %v1409_v30  ;;  %p1791_p7 = pnand %p1790_p6, %p1784_p2 }
  0x34   : > { %1557 = vmatprep.mubr.msk.bf16.mxu0 %vm379_vm2, %v1410_v31 }
  0x35   : > { %1528 = vmatmul.mubr.msk.bf16.gmra.mrb[8].mxu1 %vm379_vm2, %v1384_v35 }
  0x36   : > { %1531 = vmatprep.mubr.msk.bf16.mxu1 %vm379_vm2, %v1385_v36 }
  0x3b   : > { %1558 = vmatmul.mubr.msk.bf16.gmra.mrb[12].mxu0 %vm379_vm2, %v1411_v38 }
  0x3c   : > { %1561 = vmatprep.mubr.msk.bf16.mxu0 %vm379_vm2, %v1412_v39 }
  0x3d   : > { %1532 = vmatmul.mubr.msk.bf16.gmra.mrb[12].mxu1 %vm379_vm2, %v1386_v43 }
  0x3e   : > { %1535 = vmatprep.mubr.msk.bf16.mxu1 %vm379_vm2, %v1387_v44 }
  0x43   : > { %1562 = vmatmul.mubr.msk.bf16.gmra.mrb[16].mxu0 %vm379_vm2, %v1413_v46 }
  0x44   : > { %1565 = vmatprep.mubr.msk.bf16.mxu0 %vm379_vm2, %v1414_v47 }
  0x45   : > { %1536 = vmatmul.mubr.msk.bf16.gmra.mrb[16].mxu1 %vm379_vm2, %v1388_v50 }
  0x46   : > { %1539 = vmatprep.mubr.msk.bf16.mxu1 %vm379_vm2, %v1389_v52 }
  0x4b   : > { %1566 = vmatmul.mubr.msk.bf16.gmra.mrb[20].mxu0 %vm379_vm2, %v1415_v54 }
  0x4c   : > { %1571 = vmatprep.mubr.msk.bf16.mxu0 %vm379_vm2, %v1407_v22  ;;  %v2114_v22 = vld [vmem:[%s2330_s2] ss:$0 sm:$0xff] }
  0x4d   : > { %1540 = vmatmul.mubr.msk.bf16.gmra.mrb[20].mxu1 %vm379_vm2, %v1390_v56 }
  0x53   : > { %1572 = vmatmul.mubr.msk.bf16.vlgmr.msra.gmra.mrb[0].mxu0 %vm379_vm2, %v1408_v23 }
  0x54   : > { %1575 = vmatprep.mubr.msk.bf16.mxu0 %vm379_vm2, %v1409_v30 }
  0x5b   : > { %1576 = vmatmul.mubr.msk.bf16.gmra.mrb[4].mxu0 %vm379_vm2, %v1410_v31 }
  0x5c   : > { %1579 = vmatprep.mubr.msk.bf16.mxu0 %vm379_vm2, %v1411_v38 }
  0x63   : > { %1580 = vmatmul.mubr.msk.bf16.gmra.mrb[8].mxu0 %vm379_vm2, %v1412_v39 }
  0x64   : > { %1583 = vmatprep.mubr.msk.bf16.mxu0 %vm379_vm2, %v1413_v46 }
  0x6b   : > { %1584 = vmatmul.mubr.msk.bf16.gmra.mrb[12].mxu0 %vm379_vm2, %v1414_v47 }
  0x6c   : > { %1587 = vmatprep.mubr.msk.bf16.mxu0 %vm379_vm2, %v1415_v54 }
  0x73   : > { %1588 = vmatmul.mubr.msk.bf16.gmra.mrb[16].mxu0 %vm379_vm2, %v1431_v58 }
  0x74   : > { %1591 = vmatprep.mubr.msk.bf16.mxu0 %vm379_vm2, %v1432_v59 }
  0x7b   : > { %1592 = vmatmul.mubr.msk.bf16.gmra.mrb[20].mxu0 %vm379_vm2, %v1780_v60 }
  0xf8   : > { %v1521_v61 = vpop.f32.mrb[0].mxu1 }
  0xf9   : > { %v454_v62 = vpop.f32.mrb[1].mxu1 }
  0xfa   : > { %v1522_v63 = vpop.f32.mrb[2].mxu1 }
  0xfb   : > { %v457_v0 = vpop.f32.mrb[3].mxu1 }
 0x100   : > { %v1525_v1 = vpop.f32.mrb[4].mxu1 }
 0x101   : > { %v470_v2 = vpop.f32.mrb[5].mxu1 }
 0x102   : > { %v1526_v3 = vpop.f32.mrb[6].mxu1 }
 0x103   : > { %v473_v4 = vpop.f32.mrb[7].mxu1 }
 0x108   : > { %v2079_v5 = vpop.f32.mrb[8].mxu1 }
 0x109   : > { %v2081_v6 = vpop.f32.mrb[9].mxu1 }
 0x10a   : > { %v2083_v7 = vpop.f32.mrb[10].mxu1 }
 0x10b   : > { %v2085_v8 = vpop.f32.mrb[11].mxu1 }
 0x110   : > { %v2087_v9 = vpop.f32.mrb[12].mxu1 }
 0x111   : > { %v2089_v10 = vpop.f32.mrb[13].mxu1 }
 0x112   : > { %v2091_v11 = vpop.f32.mrb[14].mxu1 }
 0x113   : > { %v2093_v12 = vpop.f32.mrb[15].mxu1 }
 0x118   : > { %v2095_v13 = vpop.f32.mrb[16].mxu1 }
 0x119   : > { %v2097_v14 = vpop.f32.mrb[17].mxu1 }
 0x11a   : > { %v2099_v15 = vpop.f32.mrb[18].mxu1 }
 0x11b   : > { %v2101_v16 = vpop.f32.mrb[19].mxu1 }
 0x120   : > { %v2103_v17 = vpop.f32.mrb[20].mxu1 }
 0x121   : > { %v2105_v18 = vpop.f32.mrb[21].mxu1 }
 0x122   : > { %v2107_v19 = vpop.f32.mrb[22].mxu1 }
 0x123   : > { %v2109_v20 = vpop.f32.mrb[23].mxu1 }
 0x126   : > { %v1573_v21 = vpop.f32.mrb[0].mxu0 }
 0x127   : > { %v1621_v23 = vadd.f32 %v1573_v21, %v1521_v61  ;;  %v803_v24 = vpop.f32.mrb[1].mxu0 }
 0x128   : > { %v1622_v26 = vadd.f32 %v803_v24, %v454_v62  ;;  %v1574_v27 = vpop.f32.mrb[2].mxu0 }
 0x129   : > { %v931_v28 = vmul.f32 %v1621_v23, %v2114_v22  ;;  %v1623_v29 = vadd.f32 %v1574_v27, %v1522_v63  ;;  %v806_v30 = vpop.f32.mrb[3].mxu0 }
 0x12a   : > { %v929_v31 = vmul.f32 %v1622_v26, %v2114_v22  ;;  %v1624_v32 = vadd.f32 %v806_v30, %v457_v0 }
 0x12b   : > { %v962_v33 = vadd.f32 %v2119_v25, %v931_v28  ;;  %v932_v34 = vmul.f32 %v1623_v29, %v2114_v22 }
 0x12c   : > { %v960_v35 = vadd.f32 %v2119_v25, %v929_v31  ;;  %v930_v36 = vmul.f32 %v1624_v32, %v2114_v22 }
 0x12d   : > { %vm986_vm3 = vcmp.gt.f32.partialorder %v962_v33, 0.0  ;;  %v1010_v37 = vmul.f32 0.1, %v962_v33  ;;  %v963_v38 = vadd.f32 %v2119_v25, %v932_v34 }
 0x12e   : > { %vm984_vm4 = vcmp.gt.f32.partialorder %v960_v35, 0.0  ;;  %v1008_v39 = vmul.f32 0.1, %v960_v35  ;;  %v961_v40 = vadd.f32 %v2119_v25, %v930_v36  ;;  %v1577_v41 = vpop.f32.mrb[4].mxu0 }
 0x12f   : > { %vm987_vm5 = vcmp.gt.f32.partialorder %v963_v38, 0.0  ;;  %v1011_v42 = vmul.f32 0.1, %v963_v38  ;;  %v1625_v43 = vadd.f32 %v1577_v41, %v1525_v1  ;;  %v819_v44 = vpop.f32.mrb[5].mxu0  ;;  %v1034_v45 = vsel %vm986_vm3, %v962_v33, %v1010_v37 }
 0x130   : > { %vm985_vm7 = vcmp.gt.f32.partialorder %v961_v40, 0.0  ;;  %v1009_v46 = vmul.f32 0.1, %v961_v40  ;;  %v1626_v47 = vadd.f32 %v819_v44, %v470_v2  ;;  %v1578_v48 = vpop.f32.mrb[6].mxu0  ;;  %v1032_v53 = vsel %vm984_vm4, %v960_v35, %v1008_v39 }
 0x131   : > { %v1035_v49 = vsel %vm987_vm5, %v963_v38, %v1011_v42  ;;  %v935_v50 = vmul.f32 %v1625_v43, %v2114_v22  ;;  %v1627_v51 = vadd.f32 %v1578_v48, %v1526_v3  ;;  %v822_v52 = vpop.f32.mrb[7].mxu0 }
 0x132   : > { %v1057_v54 = vpack.c.bf16 %v1035_v49, %v1034_v45  ;;  %v933_v55 = vmul.f32 %v1626_v47, %v2114_v22  ;;  %v1628_v56 = vadd.f32 %v822_v52, %v473_v4  ;;  %v1033_v57 = vsel %vm985_vm7, %v961_v40, %v1009_v46 }
 0x133   : > { %v966_v58 = vadd.f32 %v2119_v25, %v935_v50  ;;  %v936_v59 = vmul.f32 %v1627_v51, %v2114_v22  ;;  %v1056_v60 = vpack.c.bf16 %v1033_v57, %v1032_v53 }
 0x134   : > { %v964_v61 = vadd.f32 %v2119_v25, %v933_v55  ;;  %v934_v62 = vmul.f32 %v1628_v56, %v2114_v22 }
 0x135   : > { %vm990_vm8 = vcmp.gt.f32.partialorder %v966_v58, 0.0  ;;  %v1014_v63 = vmul.f32 0.1, %v966_v58  ;;  %v967_v0 = vadd.f32 %v2119_v25, %v936_v59  ;;  %1597 = vmatprep.mubr.msk.bf16.mxu1 %vm1076_vm6, %v1056_v60 }
 0x136   : > { %vm988_vm9 = vcmp.gt.f32.partialorder %v964_v61, 0.0  ;;  %v1012_v1 = vmul.f32 0.1, %v964_v61  ;;  %v965_v2 = vadd.f32 %v2119_v25, %v934_v62  ;;  %v1581_v3 = vpop.f32.mrb[8].mxu0  ;;  %1598 = vmatmul.mubr.msk.bf16.vlgmr.msra.gmra.mrb[24].mxu1 %vm1076_vm6, %v1057_v54 }
 0x137   : > { %vm991_vm10 = vcmp.gt.f32.partialorder %v967_v0, 0.0  ;;  %v1015_v4 = vmul.f32 0.1, %v967_v0  ;;  %v1629_v21 = vadd.f32 %v1581_v3, %v2079_v5  ;;  %v835_v23 = vpop.f32.mrb[9].mxu0  ;;  %v1038_v28 = vsel %vm990_vm8, %v966_v58, %v1014_v63 }
 0x138   : > { %vm989_vm11 = vcmp.gt.f32.partialorder %v965_v2, 0.0  ;;  %v1013_v24 = vmul.f32 0.1, %v965_v2  ;;  %v1630_v26 = vadd.f32 %v835_v23, %v2081_v6  ;;  %v1582_v27 = vpop.f32.mrb[10].mxu0  ;;  %v1036_v32 = vsel %vm988_vm9, %v964_v61, %v1012_v1 }
 0x139   : > { %v939_v29 = vmul.f32 %v1629_v21, %v2114_v22  ;;  %v1631_v30 = vadd.f32 %v1582_v27, %v2083_v7  ;;  %v838_v31 = vpop.f32.mrb[11].mxu0  ;;  %v1039_v33 = vsel %vm991_vm10, %v967_v0, %v1015_v4 }
 0x13a   : > { %v937_v34 = vmul.f32 %v1630_v26, %v2114_v22  ;;  %v1632_v5 = vadd.f32 %v838_v31, %v2085_v8  ;;  %v1037_v35 = vsel %vm989_vm11, %v965_v2, %v1013_v24  ;;  %v1059_v36 = vpack.c.bf16 %v1039_v33, %v1038_v28 }
 0x13b   : > { %v970_v37 = vadd.f32 %v2119_v25, %v939_v29  ;;  %v940_v6 = vmul.f32 %v1631_v30, %v2114_v22  ;;  %v1058_v38 = vpack.c.bf16 %v1037_v35, %v1036_v32 }
 0x13c   : > { %v968_v39 = vadd.f32 %v2119_v25, %v937_v34  ;;  %v938_v40 = vmul.f32 %v1632_v5, %v2114_v22 }
 0x13d   : > { %vm994_vm12 = vcmp.gt.f32.partialorder %v970_v37, 0.0  ;;  %v1018_v7 = vmul.f32 0.1, %v970_v37  ;;  %v971_v41 = vadd.f32 %v2119_v25, %v940_v6  ;;  %1601 = vmatprep.mubr.msk.bf16.mxu1 %vm1076_vm6, %v1058_v38 }
 0x13e   : > { %vm992_vm13 = vcmp.gt.f32.partialorder %v968_v39, 0.0  ;;  %v1016_v42 = vmul.f32 0.1, %v968_v39  ;;  %v969_v8 = vadd.f32 %v2119_v25, %v938_v40  ;;  %v1585_v43 = vpop.f32.mrb[12].mxu0  ;;  %1602 = vmatmul.mubr.msk.bf16.gmra.mrb[28].mxu1 %vm1076_vm6, %v1059_v36 }
 0x13f   : > { %vm995_vm14 = vcmp.gt.f32.partialorder %v971_v41, 0.0  ;;  %v1019_v44 = vmul.f32 0.1, %v971_v41  ;;  %v1633_v45 = vadd.f32 %v1585_v43, %v2087_v9  ;;  %v851_v46 = vpop.f32.mrb[13].mxu0  ;;  %v1042_v50 = vsel %vm994_vm12, %v970_v37, %v1018_v7 }
 0x140   : > { %vm993_vm15 = vcmp.gt.f32.partialorder %v969_v8, 0.0  ;;  %v1017_v47 = vmul.f32 0.1, %v969_v8  ;;  %v1634_v48 = vadd.f32 %v851_v46, %v2089_v10  ;;  %v1586_v49 = vpop.f32.mrb[14].mxu0  ;;  %v1040_v54 = vsel %vm992_vm13, %v968_v39, %v1016_v42 }
 0x141   : > { %v943_v51 = vmul.f32 %v1633_v45, %v2114_v22  ;;  %v1635_v52 = vadd.f32 %v1586_v49, %v2091_v11  ;;  %v854_v53 = vpop.f32.mrb[15].mxu0  ;;  %v1043_v55 = vsel %vm995_vm14, %v971_v41, %v1019_v44 }
 0x142   : > { %v941_v56 = vmul.f32 %v1634_v48, %v2114_v22  ;;  %v1636_v9 = vadd.f32 %v854_v53, %v2093_v12  ;;  %v1041_v57 = vsel %vm993_vm15, %v969_v8, %v1017_v47  ;;  %v1061_v58 = vpack.c.bf16 %v1043_v55, %v1042_v50 }
 0x143   : > { %v974_v59 = vadd.f32 %v2119_v25, %v943_v51  ;;  %v944_v10 = vmul.f32 %v1635_v52, %v2114_v22  ;;  %v1060_v60 = vpack.c.bf16 %v1041_v57, %v1040_v54 }
 0x144   : > { %v972_v61 = vadd.f32 %v2119_v25, %v941_v56  ;;  %v942_v62 = vmul.f32 %v1636_v9, %v2114_v22 }
 0x145   : > { %vm998_vm0 = vcmp.gt.f32.partialorder %v974_v59, 0.0  ;;  %v1022_v11 = vmul.f32 0.1, %v974_v59  ;;  %v975_v63 = vadd.f32 %v2119_v25, %v944_v10  ;;  %1605 = vmatprep.mubr.msk.bf16.mxu1 %vm1076_vm6, %v1060_v60 }
 0x146   : > { %vm996_vm1 = vcmp.gt.f32.partialorder %v972_v61, 0.0  ;;  %v1020_v0 = vmul.f32 0.1, %v972_v61  ;;  %v973_v12 = vadd.f32 %v2119_v25, %v942_v62  ;;  %v1589_v1 = vpop.f32.mrb[16].mxu0  ;;  %1606 = vmatmul.mubr.msk.bf16.gmra.mrb[32].mxu1 %vm1076_vm6, %v1061_v58 }
 0x147   : > { %vm999_vm2 = vcmp.gt.f32.partialorder %v975_v63, 0.0  ;;  %v1023_v2 = vmul.f32 0.1, %v975_v63  ;;  %v1637_v3 = vadd.f32 %v1589_v1, %v2095_v13  ;;  %v867_v4 = vpop.f32.mrb[17].mxu0  ;;  %v1046_v26 = vsel %vm998_vm0, %v974_v59, %v1022_v11 }
 0x148   : > { %vm997_vm3 = vcmp.gt.f32.partialorder %v973_v12, 0.0  ;;  %v1021_v21 = vmul.f32 0.1, %v973_v12  ;;  %v1638_v23 = vadd.f32 %v867_v4, %v2097_v14  ;;  %v1590_v24 = vpop.f32.mrb[18].mxu0  ;;  %v1044_v30 = vsel %vm996_vm1, %v972_v61, %v1020_v0 }
 0x149   : > { %v947_v27 = vmul.f32 %v1637_v3, %v2114_v22  ;;  %v1639_v28 = vadd.f32 %v1590_v24, %v2099_v15  ;;  %v870_v29 = vpop.f32.mrb[19].mxu0  ;;  %v1047_v31 = vsel %vm999_vm2, %v975_v63, %v1023_v2 }
 0x14a   : > { %v945_v32 = vmul.f32 %v1638_v23, %v2114_v22  ;;  %v1640_v13 = vadd.f32 %v870_v29, %v2101_v16  ;;  %v1045_v33 = vsel %vm997_vm3, %v973_v12, %v1021_v21  ;;  %v1063_v34 = vpack.c.bf16 %v1047_v31, %v1046_v26 }
 0x14b   : > { %v978_v5 = vadd.f32 %v2119_v25, %v947_v27  ;;  %v948_v14 = vmul.f32 %v1639_v28, %v2114_v22  ;;  %v1062_v35 = vpack.c.bf16 %v1045_v33, %v1044_v30 }
 0x14c   : > { %v976_v36 = vadd.f32 %v2119_v25, %v945_v32  ;;  %v946_v37 = vmul.f32 %v1640_v13, %v2114_v22 }
 0x14d   : > { %vm1002_vm4 = vcmp.gt.f32.partialorder %v978_v5, 0.0  ;;  %v1026_v15 = vmul.f32 0.1, %v978_v5  ;;  %v979_v6 = vadd.f32 %v2119_v25, %v948_v14  ;;  %1609 = vmatprep.mubr.msk.bf16.mxu1 %vm1076_vm6, %v1062_v35 }
 0x14e   : > { %vm1000_vm5 = vcmp.gt.f32.partialorder %v976_v36, 0.0  ;;  %v1024_v38 = vmul.f32 0.1, %v976_v36  ;;  %v977_v16 = vadd.f32 %v2119_v25, %v946_v37  ;;  %v1593_v39 = vpop.f32.mrb[20].mxu0  ;;  %1610 = vmatmul.mubr.msk.bf16.gmra.mrb[36].mxu1 %vm1076_vm6, %v1063_v34 }
 0x14f   : > { %vm1003_vm7 = vcmp.gt.f32.partialorder %v979_v6, 0.0  ;;  %v1027_v40 = vmul.f32 0.1, %v979_v6  ;;  %v1641_v7 = vadd.f32 %v1593_v39, %v2103_v17  ;;  %v883_v41 = vpop.f32.mrb[21].mxu0  ;;  %v1050_v44 = vsel %vm1002_vm4, %v978_v5, %v1026_v15 }
 0x150   : > { %vm1001_vm8 = vcmp.gt.f32.partialorder %v977_v16, 0.0  ;;  %v1025_v42 = vmul.f32 0.1, %v977_v16  ;;  %v1642_v8 = vadd.f32 %v883_v41, %v2105_v18  ;;  %v1594_v43 = vpop.f32.mrb[22].mxu0  ;;  %v1048_v48 = vsel %vm1000_vm5, %v976_v36, %v1024_v38 }
 0x151   : > { %v951_v45 = vmul.f32 %v1641_v7, %v2114_v22  ;;  %v1643_v46 = vadd.f32 %v1594_v43, %v2107_v19  ;;  %v886_v47 = vpop.f32.mrb[23].mxu0  ;;  %v1051_v49 = vsel %vm1003_vm7, %v979_v6, %v1027_v40 }
 0x152   : > { %v949_v50 = vmul.f32 %v1642_v8, %v2114_v22  ;;  %v1644_v17 = vadd.f32 %v886_v47, %v2109_v20  ;;  %v1049_v51 = vsel %vm1001_vm8, %v977_v16, %v1025_v42  ;;  %v1065_v52 = vpack.c.bf16 %v1051_v49, %v1050_v44 }
 0x153   : > { %v982_v53 = vadd.f32 %v2119_v25, %v951_v45  ;;  %v952_v18 = vmul.f32 %v1643_v46, %v2114_v22  ;;  %v1064_v54 = vpack.c.bf16 %v1049_v51, %v1048_v48 }
 0x154   : > { %v980_v55 = vadd.f32 %v2119_v25, %v949_v50  ;;  %v950_v56 = vmul.f32 %v1644_v17, %v2114_v22 }
 0x155   : > { %v1030_v19 = vmul.f32 0.1, %v982_v53  ;;  %v983_v9 = vadd.f32 %v2119_v25, %v952_v18  ;;  %1613 = vmatprep.mubr.msk.bf16.mxu1 %vm1076_vm6, %v1064_v54  ;;  %vm1006_vm9 = vcmp.gt.f32.partialorder %v982_v53, 0.0 }
 0x156   : > { %v1028_v57 = vmul.f32 0.1, %v980_v55  ;;  %v981_v20 = vadd.f32 %v2119_v25, %v950_v56  ;;  %1614 = vmatmul.mubr.msk.bf16.gmra.mrb[40].mxu1 %vm1076_vm6, %v1065_v52  ;;  %vm1004_vm10 = vcmp.gt.f32.partialorder %v980_v55, 0.0  ;;  %v2212_v25 = vld [vmem:[%s2333_s5] ss:$0 sm:$0xff] }
 0x157   : > { %vm1007_vm11 = vcmp.gt.f32.partialorder %v983_v9, 0.0  ;;  %v1031_v58 = vmul.f32 0.1, %v983_v9  ;;  %v1054_v10 = vsel %vm1006_vm9, %v982_v53, %v1030_v19 }
 0x158   : > { %vm1005_vm12 = vcmp.gt.f32.partialorder %v981_v20, 0.0  ;;  %v1029_v59 = vmul.f32 0.1, %v981_v20  ;;  %v1052_v60 = vsel %vm1004_vm10, %v980_v55, %v1028_v57 }
 0x159   : > { %v1055_v22 = vsel %vm1007_vm11, %v983_v9, %v1031_v58 }
 0x15a   : > { %v1053_v61 = vsel %vm1005_vm12, %v981_v20, %v1029_v59  ;;  %v1067_v62 = vpack.c.bf16 %v1055_v22, %v1054_v10 }
 0x15b   : > { %v1066_v11 = vpack.c.bf16 %v1053_v61, %v1052_v60 }
 0x15d   : > { %1617 = vmatprep.mubr.msk.bf16.mxu1 %vm1076_vm6, %v1066_v11 }
 0x15e   : > { %1618 = vmatmul.mubr.msk.bf16.gmra.mrb[44].mxu1 %vm1076_vm6, %v1067_v62 }
 0x209   : > { %v1599_v63 = vpop.f32.mrb[24].mxu1 }
 0x20a   : > { %v1160_v0 = vadd.f32 %v1599_v63, %v2212_v25  ;;  %v1151_v12 = vpop.f32.mrb[25].mxu1 }
 0x20b   : > { %v1152_v1 = vadd.f32 %v2212_v25, %v1151_v12  ;;  %v1600_v2 = vpop.f32.mrb[26].mxu1 }
 0x20c   : > { %1248 = vst [vmem:[%s2216_s18 + $0x10] sm:$0xff] %v1160_v0  ;;  %v1163_v3 = vadd.f32 %v1600_v2, %v2212_v25  ;;  %v1154_v4 = vpop.f32.mrb[27].mxu1 }
 0x20d   : > { %1246 = vst [vmem:[%s2216_s18] sm:$0xff] %v1152_v1  ;;  %v1155_v21 = vadd.f32 %v2212_v25, %v1154_v4 }
 0x20e   : > { %1249 = vst [vmem:[%s2216_s18 + $0x18] sm:$0xff] %v1163_v3 }
 0x20f   : > { %1247 = vst [vmem:[%s2216_s18 + $0x8] sm:$0xff] %v1155_v21 }
 0x211   : > { %v1603_v23 = vpop.f32.mrb[28].mxu1 }
 0x212   : > { %v1176_v24 = vadd.f32 %v1603_v23, %v2212_v25  ;;  %v1167_v26 = vpop.f32.mrb[29].mxu1 }
 0x213   : > { %v1168_v27 = vadd.f32 %v2212_v25, %v1167_v26  ;;  %v1604_v28 = vpop.f32.mrb[30].mxu1 }
 0x214   : > { %1252 = vst [vmem:[%s2216_s18 + $0x30] sm:$0xff] %v1176_v24  ;;  %v1179_v29 = vadd.f32 %v1604_v28, %v2212_v25  ;;  %v1170_v30 = vpop.f32.mrb[31].mxu1 }
 0x215   : > { %1250 = vst [vmem:[%s2216_s18 + $0x20] sm:$0xff] %v1168_v27  ;;  %v1171_v31 = vadd.f32 %v2212_v25, %v1170_v30 }
 0x216   : > { %1253 = vst [vmem:[%s2216_s18 + $0x38] sm:$0xff] %v1179_v29 }
 0x217   : > { %1251 = vst [vmem:[%s2216_s18 + $0x28] sm:$0xff] %v1171_v31 }
 0x219   : > { %v1607_v32 = vpop.f32.mrb[32].mxu1 }
 0x21a   : > { %v1192_v13 = vadd.f32 %v1607_v32, %v2212_v25  ;;  %v1183_v33 = vpop.f32.mrb[33].mxu1 }
 0x21b   : > { %v1184_v34 = vadd.f32 %v2212_v25, %v1183_v33  ;;  %v1608_v5 = vpop.f32.mrb[34].mxu1 }
 0x21c   : > { %1256 = vst [vmem:[%s2216_s18 + $0x50] sm:$0xff] %v1192_v13  ;;  %v1195_v14 = vadd.f32 %v1608_v5, %v2212_v25  ;;  %v1186_v35 = vpop.f32.mrb[35].mxu1 }
 0x21d   : > { %1254 = vst [vmem:[%s2216_s18 + $0x40] sm:$0xff] %v1184_v34  ;;  %v1187_v36 = vadd.f32 %v2212_v25, %v1186_v35 }
 0x21e   : > { %1257 = vst [vmem:[%s2216_s18 + $0x58] sm:$0xff] %v1195_v14 }
 0x21f   : > { %1255 = vst [vmem:[%s2216_s18 + $0x48] sm:$0xff] %v1187_v36 }
 0x221   : > { %v1611_v37 = vpop.f32.mrb[36].mxu1 }
 0x222   : > { %v1208_v15 = vadd.f32 %v1611_v37, %v2212_v25  ;;  %v1199_v6 = vpop.f32.mrb[37].mxu1 }
 0x223   : > { %v1200_v38 = vadd.f32 %v2212_v25, %v1199_v6  ;;  %v1612_v16 = vpop.f32.mrb[38].mxu1 }
 0x224   : > { %1260 = vst [vmem:[%s2216_s18 + $0x70] sm:$0xff] %v1208_v15  ;;  %v1211_v39 = vadd.f32 %v1612_v16, %v2212_v25  ;;  %v1202_v40 = vpop.f32.mrb[39].mxu1 }
 0x225   : > { %1258 = vst [vmem:[%s2216_s18 + $0x60] sm:$0xff] %v1200_v38  ;;  %v1203_v7 = vadd.f32 %v2212_v25, %v1202_v40 }
 0x226   : > { %1261 = vst [vmem:[%s2216_s18 + $0x78] sm:$0xff] %v1211_v39 }
 0x227   : > { %1259 = vst [vmem:[%s2216_s18 + $0x68] sm:$0xff] %v1203_v7 }
 0x229   : > { %v1615_v41 = vpop.f32.mrb[40].mxu1 }
 0x22a   : > { %v1224_v42 = vadd.f32 %v1615_v41, %v2212_v25  ;;  %v1215_v8 = vpop.f32.mrb[41].mxu1 }
 0x22b   : > { %v1216_v43 = vadd.f32 %v2212_v25, %v1215_v8  ;;  %v1616_v44 = vpop.f32.mrb[42].mxu1 }
 0x22c   : > { %1264 = vst [vmem:[%s2216_s18 + $0x90] sm:$0xff] %v1224_v42  ;;  %v1227_v45 = vadd.f32 %v1616_v44, %v2212_v25  ;;  %v1218_v46 = vpop.f32.mrb[43].mxu1 }
 0x22d   : > { %1262 = vst [vmem:[%s2216_s18 + $0x80] sm:$0xff] %v1216_v43  ;;  %v1219_v47 = vadd.f32 %v2212_v25, %v1218_v46 }
 0x22e   : > { %1265 = vst [vmem:[%s2216_s18 + $0x98] sm:$0xff] %v1227_v45 }
 0x22f   : > { %1263 = vst [vmem:[%s2216_s18 + $0x88] sm:$0xff] %v1219_v47 }
 0x231   : > { %v1619_v48 = vpop.f32.mrb[44].mxu1 }
 0x232   : > { %v1240_v49 = vadd.f32 %v1619_v48, %v2212_v25  ;;  %v1231_v50 = vpop.f32.mrb[45].mxu1 }
 0x233   : > { %v1232_v17 = vadd.f32 %v2212_v25, %v1231_v50  ;;  %v1620_v51 = vpop.f32.mrb[46].mxu1 }
 0x234   : > { %1268 = vst [vmem:[%s2216_s18 + $0xb0] sm:$0xff] %v1240_v49  ;;  %v1243_v52 = vadd.f32 %v1620_v51, %v2212_v25  ;;  %v1234_v53 = vpop.f32.mrb[47].mxu1 }
 0x235   : > { %1266 = vst [vmem:[%s2216_s18 + $0xa0] sm:$0xff] %v1232_v17  ;;  %v1235_v18 = vadd.f32 %v2212_v25, %v1234_v53 }
 0x236   : > { %1269 = vst [vmem:[%s2216_s18 + $0xb8] sm:$0xff] %v1243_v52 }
 0x237   : > { %1267 = vst [vmem:[%s2216_s18 + $0xa8] sm:$0xff] %v1235_v18 }
 0x238   : > { %1794 = shalt.err (!%p1791_p7)
}
 0x239   : > { %s1795_s14 = scalar_lea.hbm %s2266_s13, 3072  ;;  %s1799_s24 = scalar_lea.hbm %s2334_s6, 12288 }
 0x23a   : > { %p1796_p9 = scmp.ne.s32.totalorder %s2266_s13, %s1795_s14  ;;  %p1800_p12 = scmp.lt.u32.totalorder %s2266_s13, %s2334_s6 }
 0x23b   : > { %p1801_p13 = scmp.lt.u32.totalorder %s1799_s24, %s1795_s14  ;;  %p1803_p1 = scmp.lt.u32.totalorder %s1795_s14, %s2266_s13 }
 0x23c   : > { %p1797_p10 = pnand %p1796_p9, %p1966_p3 }
 0x23d   : > { %p1802_p0 = por %p1801_p13, %p1800_p12 }
 0x23e   : > { %p1798_p11 = pneg %p1797_p10 }
 0x23f   : > { %p1804_p2 = por %p1803_p1, %p1802_p0 }
 0x241   : > { %p1805_p4 = pnand %p1804_p2, %p1798_p11 }
 0x243   : > { %1808 = shalt.err (!%p1805_p4)
}
 0x244   : > { %s1878_s17 = smov 128   ;;  %s1879_s19 = smov 8  }
 0x245   : > { %1678 = dma.vmem_to_hbm [thread:$0]  (%p1966_p3), %s2268_s25, 3072, %s2266_s13, %s2276_s16, %s1878_s17, %s1878_s17, %s1879_s19  }
 0x246 PF: > { %p1684_p5 = scmp.ge.s32.totalorder %s1875_s28, 2  ;;  %s1301_s20 = sand.u32 1, %s1847_s21  }
 0x247   : > { %s1302_s29 = scalar_lea.sflag [#allocation3], %s1301_s20 }
 0x248   : > { %p1681_p6 = pnand %p1684_p5, %p1975_p8 }
 0x24a   : > { %1842 = dma.done.wait (!%p1681_p6), %s1302_s29, 3072  }
 0x24b   : > { %1844 = vsyncadd (!%p1681_p6), %s1302_s29, 4294964224  ;;  %s19_s28 = sadd.s32 1, %s1875_s28   ;;  %s2337_s21 = smov %s1851_s22 }
 0x24c   : > { %p16_p7 = scmp.ge.s32.totalorder %s19_s28, 6   ;;  %s2338_s22 = smov %s1855_s23 }
 0x24d   : > { %s2339_s23 = smov %s1984_s15  ;;  %s2340_s24 = smov %s1867_s26 }
 0x24e   : > { %s2341_s25 = smov %s1871_s27  ;;  %s2342_s26 = smov %s2345_s7 }
 0x24f   : > { %s2343_s27 = smov %s2349_s8  ;;  %18 = sbr.rel (!%p16_p7) target bundleno = 5 (0x5), region = 81 }
 0x256   :  { %1307 = vsyncpa [#allocation3], 1 }
 0x257   :  { %1309 = vsyncpa [#allocation3 + $0x1], 1 }

</bundles_post_ra>
